<compile_context>
chip_gen: v6e
topology: v6e:2x2x1
jax: 0.10.0
libtpu: 0.0.40
codegen_flags: <defaults>
</compile_context>

<pallas_src>
import functools

import jax
import jax.numpy as jnp
import numpy as np
from jax.experimental import pallas as pl
from jax.experimental.pallas import tpu as pltpu


def _round_up(x: int, k: int) -> int:
    return ((x + k - 1) // k) * k


def _make_loss_kernel(m: float):
    def _loss_kernel(g_ref, at_ref, wposgw_ref, wneg_ref, spos_ref, sneg_ref):
        # (tn, D) @ (D, tm) -> MXU in its natural layout (M on lanes).
        sim = jnp.dot(g_ref[...], at_ref[...],
                      preferred_element_type=jnp.float32)
        # Clamp before sqrt: fp rounding can push sim marginally above 1.
        dist = jnp.sqrt(jnp.maximum(2.0 * (1.0 - sim), 0.0))
        # Per-tile partial sums -> SMEM scalars; final reduction done in JAX.
        spos_ref[0, 0] = jnp.sum(dist * wposgw_ref[...])
        sneg_ref[0, 0] = jnp.sum(jnp.maximum(m - dist, 0.0) * wneg_ref[...])

    return _loss_kernel


@functools.partial(jax.jit, static_argnames=("m", "sigma", "tn", "tm"))
def contrastive_cosine_gaussian_loss(embed_g, embed_a, pos, neg,
                                     physical_dists, m=1.0, sigma=32.0,
                                     tn=256, tm=1024):
    embed_g = jnp.asarray(embed_g, jnp.float32)
    embed_a = jnp.asarray(embed_a, jnp.float32)
    N, D = embed_g.shape
    M = embed_a.shape[0]

    pos = jnp.asarray(pos).reshape(-1)
    neg = jnp.asarray(neg).reshape(-1)
    pd = jnp.asarray(physical_dists, jnp.float32).reshape(-1)

    # --- wrapper-side glue (cheap relative to the N*M pair compute) --------
    # Gather indices -> per-pair multiplicity counts (scatter-add reproduces
    # torch fancy-indexing exactly, including repeated indices).
    w_pos = jnp.zeros((N * M,), jnp.float32).at[pos].add(1.0)
    w_neg = jnp.zeros((N * M,), jnp.float32).at[neg].add(1.0)
    # Fold the Gaussian weight into the positive count: the kernel then only
    # streams two pairwise arrays.  exp(-0.5*(pd/sigma)^2) == exp(c*pd*pd).
    c = -0.5 / (float(sigma) ** 2)
    gw = jnp.exp(c * pd * pd)
    w_pos_gw = (w_pos * gw).reshape(N, M)
    w_neg = w_neg.reshape(N, M)

    # --- pad to tile boundaries (padded pairs have zero weight => no effect)
    tn_ = min(int(tn), _round_up(N, 8))       # sublane-aligned row tile
    tm_ = min(int(tm), _round_up(M, 128))     # lane-aligned col tile
    Np = _round_up(N, tn_)
    Mp = _round_up(M, tm_)
    Dp = _round_up(D, 128)

    g_p = jnp.zeros((Np, Dp), jnp.float32).at[:N, :D].set(embed_g)
    # Pre-transpose embed_a ONCE in HBM -> (D, M): avoids per-grid-step XLU
    # transposes of the RHS tile inside the kernel.
    at_p = jnp.zeros((Dp, Mp), jnp.float32).at[:D, :M].set(embed_a.T)
    wpos_p = jnp.zeros((Np, Mp), jnp.float32).at[:N, :M].set(w_pos_gw)
    wneg_p = jnp.zeros((Np, Mp), jnp.float32).at[:N, :M].set(w_neg)

    gi, gj = Np // tn_, Mp // tm_

    smem_out = pl.BlockSpec((1, 1), lambda i, j: (i, j),
                            memory_space=pltpu.MemorySpace.SMEM)

    spos, sneg = pl.pallas_call(
        _make_loss_kernel(float(m)),
        grid=(gi, gj),
        in_specs=[
            pl.BlockSpec((tn_, Dp), lambda i, j: (i, 0)),   # embed_g rows
            pl.BlockSpec((Dp, tm_), lambda i, j: (0, j)),   # embed_a.T cols
            pl.BlockSpec((tn_, tm_), lambda i, j: (i, j)),  # w_pos * gw
            pl.BlockSpec((tn_, tm_), lambda i, j: (i, j)),  # w_neg
        ],
        out_specs=(smem_out, smem_out),
        out_shape=(jax.ShapeDtypeStruct((gi, gj), jnp.float32),
                   jax.ShapeDtypeStruct((gi, gj), jnp.float32)),
        compiler_params=pltpu.CompilerParams(
            dimension_semantics=("parallel", "parallel")),
    )(g_p, at_p, wpos_p, wneg_p)

    n_pos = jnp.float32(pos.shape[0])
    n_neg = jnp.float32(neg.shape[0])
    # Final tiny reduction over per-tile partials (a few floats) in JAX.
    return jnp.sum(spos) / n_pos + jnp.sum(sneg) / n_neg


if __name__ == "__main__":
    key = jax.random.PRNGKey(0)
    k1, k2, k3 = jax.random.split(key, 3)

    N, M, D = 8, 8, 32
    embed_g = jax.random.normal(k1, (N, D), jnp.float32)
    embed_a = jax.random.normal(k2, (M, D), jnp.float32)
    # Unit-normalize so sim is a true cosine similarity (dist stays real).
    embed_g = embed_g / jnp.linalg.norm(embed_g, axis=-1, keepdims=True)
    embed_a = embed_a / jnp.linalg.norm(embed_a, axis=-1, keepdims=True)

    physical_dists = jax.random.uniform(k3, (N * M,), jnp.float32, 0.0, 100.0)

    idx = np.arange(N * M)
    pos = idx[idx % (M + 1) == 0]   # "matching" (diagonal) pairs
    neg = idx[idx % (M + 1) != 0]   # all other pairs

    loss = contrastive_cosine_gaussian_loss(
        embed_g, embed_a, pos, neg, physical_dists, m=1.0, sigma=32.0)
    loss = jax.block_until_ready(loss)

    # Pure-JAX reference of the exact torch semantics.
    sim = (embed_g @ embed_a.T).reshape(-1)
    dist = jnp.sqrt(2.0 * (1.0 - sim))
    gw = jnp.exp(-0.5 * (physical_dists / 32.0) ** 2)
    ref = jnp.mean(dist[pos] * gw[pos]) + jnp.mean(
        jnp.maximum(1.0 - dist[neg], 0.0))

    assert jnp.allclose(loss, ref, rtol=1e-4, atol=1e-4), (loss, ref)
    print("KERNEL_OK")
</pallas_src>

<mosaic_0001>
module attributes {stable_mosaic.version = 11 : i64} {
  func.func private @main(%arg0: i32) attributes {dimension_semantics = [#tpu.dimension_semantics<core_parallel>], iteration_bounds = array<i64: 2>, tpu.core_type = #tpu.core_type<sc_scalar_subcore>, window_params = []} {
    return
  }
}

module attributes {stable_mosaic.version = 11 : i64} {
  func.func private @main(%arg0: i32) attributes {dimension_semantics = [#tpu.dimension_semantics<core_parallel>], iteration_bounds = array<i64: 2>, tpu.core_type = #tpu.core_type<sc_scalar_subcore>, window_params = []} {
    return
  }
}

module attributes {stable_mosaic.version = 11 : i64} {
  func.func @_loss_kernel(%arg0: i32, %arg1: i32, %arg2: memref<8x128xf32, #tpu.memory_space<vmem>>, %arg3: memref<128x128xf32, #tpu.memory_space<vmem>>, %arg4: memref<8x128xf32, #tpu.memory_space<vmem>>, %arg5: memref<8x128xf32, #tpu.memory_space<vmem>>, %arg6: memref<1x1xf32, #tpu.memory_space<smem>>, %arg7: memref<1x1xf32, #tpu.memory_space<smem>>) attributes {dimension_semantics = [#tpu.dimension_semantics<parallel>, #tpu.dimension_semantics<parallel>], iteration_bounds = array<i64: 1, 1>, scalar_prefetch = 0 : i64, scratch_operands = 0 : i64, tpu.core_type = #tpu.core_type<tc>, window_params = [{transform_indices = @transform_0, window_bounds = array<i64: 8, 128>}, {transform_indices = @transform_1, window_bounds = array<i64: 128, 128>}, {transform_indices = @transform_2, window_bounds = array<i64: 8, 128>}, {transform_indices = @transform_3, window_bounds = array<i64: 8, 128>}, {transform_indices = @transform_4, window_bounds = array<i64: 1, 1>}, {transform_indices = @transform_5, window_bounds = array<i64: 1, 1>}]} {
    %c0 = arith.constant 0 : index
    %c0_0 = arith.constant 0 : index
    %0 = vector.load %arg2[%c0, %c0_0] : memref<8x128xf32, #tpu.memory_space<vmem>>, vector<8x128xf32>
    %c0_1 = arith.constant 0 : index
    %c0_2 = arith.constant 0 : index
    %1 = vector.load %arg3[%c0_1, %c0_2] : memref<128x128xf32, #tpu.memory_space<vmem>>, vector<128x128xf32>
    %cst = arith.constant dense<0.000000e+00> : vector<8x128xf32>
    %2 = tpu.matmul %0, %1, %cst {dimension_numbers = #tpu.dot_dimension_numbers<[1], [0], [0], [1], [0, 0, 1, 1], [], []>} : vector<8x128xf32>, vector<128x128xf32>, vector<8x128xf32> -> vector<8x128xf32>
    %cst_3 = arith.constant 1.000000e+00 : f32
    %3 = vector.broadcast %cst_3 : f32 to vector<8x128xf32>
    %4 = arith.subf %3, %2 : vector<8x128xf32>
    %cst_4 = arith.constant 2.000000e+00 : f32
    %5 = vector.broadcast %cst_4 : f32 to vector<8x128xf32>
    %6 = arith.mulf %5, %4 : vector<8x128xf32>
    %cst_5 = arith.constant 0.000000e+00 : f32
    %7 = vector.broadcast %cst_5 : f32 to vector<8x128xf32>
    %8 = arith.maximumf %6, %7 : vector<8x128xf32>
    %9 = math.sqrt %8 : vector<8x128xf32>
    %c0_6 = arith.constant 0 : index
    %c0_7 = arith.constant 0 : index
    %10 = vector.load %arg4[%c0_6, %c0_7] : memref<8x128xf32, #tpu.memory_space<vmem>>, vector<8x128xf32>
    %11 = arith.mulf %9, %10 : vector<8x128xf32>
    %12 = vector.shape_cast %11 : vector<8x128xf32> to vector<1x8x128xf32>
    %cst_8 = arith.constant dense<0.000000e+00> : vector<1xf32>
    %13 = vector.multi_reduction <add>, %12, %cst_8 [1, 2] : vector<1x8x128xf32> to vector<1xf32>
    %14 = vector.shape_cast %13 : vector<1xf32> to vector<1x1x1xf32>
    %15 = vector.extract %14[0, 0, 0] : f32 from vector<1x1x1xf32>
    %c0_9 = arith.constant 0 : index
    %c0_10 = arith.constant 0 : index
    %16 = memref.load %arg6[%c0_9, %c0_10] : memref<1x1xf32, #tpu.memory_space<smem>>
    memref.store %15, %arg6[%c0_9, %c0_10] : memref<1x1xf32, #tpu.memory_space<smem>>
    %cst_11 = arith.constant 1.000000e+00 : f32
    %17 = vector.broadcast %cst_11 : f32 to vector<8x128xf32>
    %18 = arith.subf %17, %9 : vector<8x128xf32>
    %cst_12 = arith.constant 0.000000e+00 : f32
    %19 = vector.broadcast %cst_12 : f32 to vector<8x128xf32>
    %20 = arith.maximumf %18, %19 : vector<8x128xf32>
    %c0_13 = arith.constant 0 : index
    %c0_14 = arith.constant 0 : index
    %21 = vector.load %arg5[%c0_13, %c0_14] : memref<8x128xf32, #tpu.memory_space<vmem>>, vector<8x128xf32>
    %22 = arith.mulf %20, %21 : vector<8x128xf32>
    %23 = vector.shape_cast %22 : vector<8x128xf32> to vector<1x8x128xf32>
    %cst_15 = arith.constant dense<0.000000e+00> : vector<1xf32>
    %24 = vector.multi_reduction <add>, %23, %cst_15 [1, 2] : vector<1x8x128xf32> to vector<1xf32>
    %25 = vector.shape_cast %24 : vector<1xf32> to vector<1x1x1xf32>
    %26 = vector.extract %25[0, 0, 0] : f32 from vector<1x1x1xf32>
    %c0_16 = arith.constant 0 : index
    %c0_17 = arith.constant 0 : index
    %27 = memref.load %arg7[%c0_16, %c0_17] : memref<1x1xf32, #tpu.memory_space<smem>>
    memref.store %26, %arg7[%c0_16, %c0_17] : memref<1x1xf32, #tpu.memory_space<smem>>
    return
  }
  func.func @transform_0(%arg0: i32, %arg1: i32) -> (i32, i32) {
    %c0_i32 = arith.constant 0 : i32
    %c0_i32_0 = arith.constant 0 : i32
    return %arg0, %c0_i32 : i32, i32
  }
  func.func @transform_1(%arg0: i32, %arg1: i32) -> (i32, i32) {
    %c0_i32 = arith.constant 0 : i32
    %c0_i32_0 = arith.constant 0 : i32
    return %c0_i32, %arg1 : i32, i32
  }
  func.func @transform_2(%arg0: i32, %arg1: i32) -> (i32, i32) {
    %c0_i32 = arith.constant 0 : i32
    return %arg0, %arg1 : i32, i32
  }
  func.func @transform_3(%arg0: i32, %arg1: i32) -> (i32, i32) {
    %c0_i32 = arith.constant 0 : i32
    return %arg0, %arg1 : i32, i32
  }
  func.func @transform_4(%arg0: i32, %arg1: i32) -> (i32, i32) {
    %c0_i32 = arith.constant 0 : i32
    return %arg0, %arg1 : i32, i32
  }
  func.func @transform_5(%arg0: i32, %arg1: i32) -> (i32, i32) {
    %c0_i32 = arith.constant 0 : i32
    return %arg0, %arg1 : i32, i32
  }
}

</mosaic_0001>

<bundles_post_ra>
// kernel: contrastive_cosine_gaussian_loss.1
= control target key start
LH: loop header
LB: loop body
LE: loop exit
PB: predicated region body
PF: predicated region fallthrough
CT: control target
= control target key end

     0   :  { %11 = vsyncpa [#allocation3], 0  ;;  %v253_v1 = vmov 0.0   ;;  %vm254_vm0 = vmmov 0   ;;  %s350_s0 = inlined_call_operand.vmem [shape: f32[8,128], index: 0, kind: input, shape index: {}]   ;;  %s351_s1 = inlined_call_operand.vmem [shape: f32[128,128], index: 1, kind: input, shape index: {}]   ;;  %s352_s2 = inlined_call_operand.vmem [shape: f32[8,128], index: 2, kind: input, shape index: {}]   ;;  %s353_s3 = inlined_call_operand.vmem [shape: f32[8,128], index: 3, kind: input, shape index: {}]   ;;  %s354_s4 = inlined_call_operand.hbm [shape: f32[1,1], index: 4, kind: output, shape index: {0}]   ;;  %s355_s5 = inlined_call_operand.hbm [shape: f32[1,1], index: 5, kind: output, shape index: {1}]  }
   0x1   :  { %v37_v0 = vld [vmem:[%s351_s1 + $0x78] sm:$0xff]  ;;  %188 = vmatprep.subr.mxu0 %v253_v1  ;;  %v36_v2 = vld [vmem:[%s351_s1 + $0x70] sm:$0xff]  ;;  %220 = vmatprep.mubr.msk.f32.mxu0 %vm254_vm0, %v253_v1  ;;  %v35_v3 = vld [vmem:[%s351_s1 + $0x68] sm:$0xff] }
   0x2   :  { %189 = vmatpush3.msra.mxu0 %v37_v0  ;;  %v34_v4 = vld [vmem:[%s351_s1 + $0x60] sm:$0xff] }
   0x3   :  { %190 = vmatprep.subr.mxu0 %v253_v1 }
   0x4   :  { %191 = vmatpush3.msra.mxu0 %v36_v2 }
   0x5   :  { %192 = vmatprep.subr.mxu0 %v253_v1 }
   0x6   :  { %12 = vsyncpa [#allocation5], 0  ;;  %193 = vmatpush3.msra.mxu0 %v35_v3  ;;  %v33_v5 = vld [vmem:[%s351_s1 + $0x58] sm:$0xff]  ;;  %v32_v6 = vld [vmem:[%s351_s1 + $0x50] sm:$0xff]  ;;  %s256_s7 = smov [#allocation4]  }
   0x7   :  { %194 = vmatprep.subr.mxu0 %v253_v1  ;;  %v31_v7 = vld [vmem:[%s351_s1 + $0x48] sm:$0xff]  ;;  %v30_v8 = vld [vmem:[%s351_s1 + $0x40] sm:$0xff]  ;;  %v29_v9 = vld [vmem:[%s351_s1 + $0x38] sm:$0xff] }
   0x8   :  { %195 = vmatpush3.msra.mxu0 %v34_v4  ;;  %v28_v10 = vld [vmem:[%s351_s1 + $0x30] sm:$0xff]  ;;  %v27_v11 = vld [vmem:[%s351_s1 + $0x28] sm:$0xff]  ;;  %v26_v12 = vld [vmem:[%s351_s1 + $0x20] sm:$0xff] }
   0x9   :  { %196 = vmatprep.subr.mxu0 %v253_v1  ;;  %v25_v13 = vld [vmem:[%s351_s1 + $0x18] sm:$0xff]  ;;  %v24_v14 = vld [vmem:[%s351_s1 + $0x10] sm:$0xff]  ;;  %v23_v15 = vld [vmem:[%s351_s1 + $0x8] sm:$0xff] }
   0xa   :  { %197 = vmatpush3.msra.mxu0 %v33_v5  ;;  %v22_v16 = vld [vmem:[%s351_s1] sm:$0xff] }
   0xb   :  { %198 = vmatprep.subr.mxu0 %v253_v1  ;;  %v21_v17 = vld [vmem:[%s350_s0] sm:$0xff] }
   0xc   :  { %199 = vmatpush3.msra.mxu0 %v32_v6  ;;  %v118_v26 = vld [vmem:[%s352_s2] sm:$0xff] }
   0xd   :  { %200 = vmatprep.subr.mxu0 %v253_v1  ;;  %v133_v31 = vld [vmem:[%s353_s3] sm:$0xff]  ;;  %s255_s3 = smov [#allocation2]  }
   0xe   :  { %201 = vmatpush3.msra.mxu0 %v31_v7 }
   0xf   :  { %202 = vmatprep.subr.mxu0 %v253_v1 }
  0x10   :  { %203 = vmatpush3.msra.mxu0 %v30_v8 }
  0x11   :  { %204 = vmatprep.subr.mxu0 %v253_v1 }
  0x12   :  { %205 = vmatpush3.msra.mxu0 %v29_v9 }
  0x13   :  { %206 = vmatprep.subr.mxu0 %v253_v1 }
  0x14   :  { %207 = vmatpush3.msra.mxu0 %v28_v10 }
  0x15   :  { %208 = vmatprep.subr.mxu0 %v253_v1 }
  0x16   :  { %209 = vmatpush3.msra.mxu0 %v27_v11 }
  0x17   :  { %210 = vmatprep.subr.mxu0 %v253_v1 }
  0x18   :  { %211 = vmatpush3.msra.mxu0 %v26_v12 }
  0x19   :  { %212 = vmatprep.subr.mxu0 %v253_v1 }
  0x1a   :  { %213 = vmatpush3.msra.mxu0 %v25_v13 }
  0x1b   :  { %214 = vmatprep.subr.mxu0 %v253_v1 }
  0x1c   :  { %215 = vmatpush3.msra.mxu0 %v24_v14 }
  0x1d   :  { %216 = vmatprep.subr.mxu0 %v253_v1 }
  0x1e   :  { %217 = vmatpush3.msra.mxu0 %v23_v15 }
  0x1f   :  { %218 = vmatprep.subr.mxu0 %v253_v1 }
  0x20   :  { %219 = vmatpush3.msra.mxu0 %v22_v16 }
  0x21   :  { %221 = vmatmul.mubr.f32.vlgmr.msra.gmra.mxu0 %v21_v17 }
  0xe1   :  { %v104_v18 = vpop.f32.mrf.mxu0 }
  0xe2   :  { %v108_v19 = vsub.f32 1.0, %v104_v18 }
  0xe3   :  { %v222_v20 = vpop.f32.mrf.mxu0 }
  0xe4   :  { %v109_v21 = vmul.f32 2.0, %v108_v19 }
  0xe6   :  { %v110_v22 = vmax.f32 %v109_v21, 0.0 }
  0xe8   :  { %231 = vrsqrt.f32 %v110_v22  ;;  %vm113_vm1 = vcmp.eq.f32.partialorder %v110_v22, inf  ;;  %v116_v25 = vand.u32 2147483648, %v110_v22  ;;  %vm115_vm2 = vcmp.eq.f32.partialorder %v110_v22, 0.0 }
  0xf5   :  { %v232_v23 = vpop.eup %231 }
  0xf6   :  { %v112_v24 = vmul.f32 %v232_v23, %v110_v22 }
  0xf8   :  { %v114_v27 = vsel %vm113_vm1, %v110_v22, %v112_v24 }
  0xf9   :  { %v117_v28 = vsel %vm115_vm2, %v116_v25, %v114_v27 }
  0xfa   :  { %v119_v29 = vmul.f32 %v118_v26, %v117_v28  ;;  %v131_v30 = vsub.f32 1.0, %v117_v28 }
  0xfc   :  { %v132_v32 = vmax.f32 %v131_v30, 0.0  ;;  %120 = vadd.xlane.f32.xlu0 %v119_v29 }
  0xfe   :  { %v134_v33 = vmul.f32 %v133_v31, %v132_v32 }
 0x100   :  { %135 = vadd.xlane.f32.xlu0 %v134_v33 }
 0x185   :  { %v121_v34 = vpop.xlane.xlu0 %120 }
 0x186   :  { %v122_v35 = vrot.slane %v121_v34, 4 }
 0x188   :  { %v123_v36 = vadd.f32 %v122_v35, %v121_v34 }
 0x189   :  { %v136_v37 = vpop.xlane.xlu0 %135 }
 0x18a   :  { %v124_v38 = vrot.slane %v123_v36, 2  ;;  %v137_v39 = vrot.slane %v136_v37, 4 }
 0x18c   :  { %v138_v40 = vadd.f32 %v137_v39, %v136_v37  ;;  %v125_v41 = vadd.f32 %v124_v38, %v123_v36 }
 0x18e   :  { %v139_v42 = vrot.slane %v138_v40, 2  ;;  %v126_v43 = vrot.slane %v125_v41, 1 }
 0x190   :  { %v140_v44 = vadd.f32 %v139_v42, %v138_v40  ;;  %v127_v45 = vadd.f32 %v126_v43, %v125_v41 }
 0x192   :  { %223 = vpush %v127_v45  ;;  %v141_v46 = vrot.slane %v140_v44, 1 }
 0x194   :  { %v142_v47 = vadd.f32 %v141_v46, %v140_v44 }
 0x196   :  { %225 = vpush %v142_v47 }
 0x1c3   :  { %s224_s2 = spop %223 }
 0x1c4   :  { %130 = sst [smem:[#allocation2]] %s224_s2 }
 0x1c5   :  { %153 = dma.smem_to_hbm %s255_s3, 16, %s354_s4, [#allocation3]  }
 0x1c7   :  { %s226_s6 = spop %225 }
 0x1c8   :  { %145 = sst [smem:[#allocation4]] %s226_s6 }
 0x1c9   :  { %161 = dma.smem_to_hbm %s256_s7, 16, %s355_s5, [#allocation5]  }
 0x1ca   :  { %249 = dma.done.wait [#allocation3], 16  }
 0x1cb   :  { %250 = vsyncadd [#allocation3], 4294967280 }
 0x1cc   :  { %251 = dma.done.wait [#allocation5], 16  }
 0x1cd   :  { %252 = vsyncadd [#allocation5], 4294967280 }
 0x1ce   :  { %168 = sfence }
 0x1cf   :  { %169 = vsyncpa [#allocation3], 1 }
 0x1d0   :  { %170 = vsyncpa [#allocation5], 1 }

</bundles_post_ra>
